<compile_context>
chip_gen: v7x
topology: tpu7x:2x2x1
jax: 0.10.0
libtpu: 0.0.40
codegen_flags: <defaults>
</compile_context>

<pallas_src>
import jax
import jax.numpy as jnp
from jax.experimental import pallas as pl
from jax.experimental.pallas import tpu as pltpu


def squeeze_dim0_metadata_only(a: jax.Array) -> jax.Array:
    """Preferred production path: squeeze is a free metadata/layout change."""
    return jnp.squeeze(a, axis=0)


def _squeeze_copy_kernel(a_hbm, out_hbm, sem):
    # Single HBM->HBM DMA of the whole (1, N) array.  No VMEM staging, no
    # masked partial vector store, no compute.
    cp = pltpu.make_async_copy(a_hbm, out_hbm, sem)
    cp.start()
    cp.wait()


def squeeze_dim0(a: jax.Array) -> jax.Array:
    """Pallas equivalent of torch.squeeze(a, 0) for a static [1, N] input.

    The pallas_call is a single HBM->HBM DMA ((1, N) -> (1, N)); the rank drop
    is a metadata-only jnp.squeeze applied to the kernel output.
    """
    assert a.ndim == 2 and a.shape[0] == 1, "expected shape [1, N]"
    n = a.shape[1]
    out_2d = pl.pallas_call(
        _squeeze_copy_kernel,
        out_shape=jax.ShapeDtypeStruct((1, n), a.dtype),
        # Leave both operands in HBM; the kernel moves them with one DMA.
        in_specs=[pl.BlockSpec(memory_space=pl.ANY)],
        out_specs=pl.BlockSpec(memory_space=pl.ANY),
        scratch_shapes=[pltpu.SemaphoreType.DMA],
    )(a)
    # Free rank drop outside the kernel (no data movement).
    return jnp.squeeze(out_2d, axis=0)


if __name__ == "__main__":
    key = jax.random.PRNGKey(0)
    # Shape matches the module's annotation: [1, 7] float32.
    a = jax.random.normal(key, (1, 7), dtype=jnp.float32)

    out = squeeze_dim0(a)
    out = jax.block_until_ready(out)

    # Verify semantics against the metadata-only reference.
    expected = squeeze_dim0_metadata_only(a)
    assert out.shape == (7,), out.shape
    assert out.dtype == jnp.float32, out.dtype
    assert jnp.allclose(out, expected), "mismatch vs reference squeeze"

    print("KERNEL_OK")
</pallas_src>

<mosaic_0001>
module attributes {stable_mosaic.version = 11 : i64} {
  func.func @_squeeze_copy_kernel(%arg0: memref<1x7xf32, #tpu.memory_space<any>>, %arg1: memref<1x7xf32, #tpu.memory_space<any>>, %arg2: memref<!tpu.dma_semaphore, #tpu.memory_space<semaphore_mem>>) attributes {dimension_semantics = [], scalar_prefetch = 0 : i64, scratch_operands = 1 : i64, tpu.core_type = #tpu.core_type<tc>} {
    tpu.enqueue_dma source(%arg0 : memref<1x7xf32, #tpu.memory_space<any>>) target(%arg1 : memref<1x7xf32, #tpu.memory_space<any>>) target_semaphore(%arg2 : memref<!tpu.dma_semaphore, #tpu.memory_space<semaphore_mem>>)
    tpu.wait_dma2 semaphore(%arg2 : memref<!tpu.dma_semaphore, #tpu.memory_space<semaphore_mem>>) src(%arg0 : memref<1x7xf32, #tpu.memory_space<any>>) dst(%arg1 : memref<1x7xf32, #tpu.memory_space<any>>)
    return
  }
}

</mosaic_0001>

<bundles_post_ra>
// kernel: tpu_custom_call.1
= control target key start
LH: loop header
LB: loop body
LE: loop exit
PB: predicated region body
PF: predicated region fallthrough
CT: control target
= control target key end

     0   :  { %s34_s6 = smov [#allocation2]   ;;  %s35_s7 = smov [#allocation3]   ;;  %s53_s0 = inlined_call_operand.hbm [shape: f32[1,7], index: 0, kind: input, shape index: {}]   ;;  %s54_s1 = inlined_call_operand.hbm [shape: f32[1,7], index: 1, kind: output, shape index: {}]  }
   0x1   :  { %s36_s8 = smov 0  }
   0x2   :  { %18 = dma.general %s53_s0, 16, %s54_s1, %s34_s6, %s35_s7, [#allocation4], %s36_s8, 0  }
   0x3   :  { %32 = dma.done.wait [#allocation2], 16 }
   0x4   :  { %33 = vsyncadd [#allocation2], 4294967280 }
   0x5   :  { %22 = vsyncmov [#allocation2] }
   0x8   :  { %s23_s13 = vpop.sfrf %22 }
   0x9   :  { %p28_p0 = scmp.ne.s32.totalorder %s23_s13, 0 }
   0xb   :  { %27 = shalt.err (%p28_p0)  }

</bundles_post_ra>
